<compile_context>
chip_gen: v7x
topology: tpu7x:2x2x1
jax: 0.10.0
libtpu: 0.0.40
codegen_flags: <defaults>
</compile_context>

<pallas_src>
import functools

import jax
import jax.numpy as jnp
from jax.experimental import pallas as pl
from jax.experimental.pallas import tpu as pltpu


def _conv_gemm_kernel(xcol_ref, w_ref, b_ref, o_ref):
    """One batch element: out = W @ P + b.

    xcol_ref : (K, S)      VMEM   im2col block, K = KH*KW*Cin, S = Ho*Wo
    w_ref    : (Cout, K)   VMEM   reshaped conv weight
    b_ref    : (Cout, 1)   VMEM   bias, lane-broadcast in the epilogue
    o_ref    : (Cout, S)   VMEM   output block (lane-dense, S >= 128)
    """
    acc = jnp.dot(w_ref[...], xcol_ref[...],
                  preferred_element_type=jnp.float32)      # (Cout, S) f32
    acc = acc + b_ref[...].astype(jnp.float32)              # broadcast over S
    o_ref[...] = acc.astype(o_ref.dtype)


def conv2d_pallas(x_nchw, w_oihw, bias, *, stride):
    """nn.Conv2d(in, out, kernel_size, stride) forward.  NCHW in / NCHW out."""
    N, Cin, H, W = x_nchw.shape
    Cout, Cin_w, KH, KW = w_oihw.shape
    assert Cin == Cin_w
    Ho = (H - KH) // stride + 1
    Wo = (W - KW) // stride + 1
    K = KH * KW * Cin
    S = Ho * Wo

    # --- XLA glue: build the im2col matrix once (tiny, fuses under jit) ----
    # xcol[n, (kh*KW+kw)*Cin + ci, ho*Wo + wo] = x[n, ci, ho*stride+kh, wo*stride+kw]
    taps = []
    for kh in range(KH):
        for kw in range(KW):
            taps.append(
                x_nchw[:, :,
                       kh:kh + (Ho - 1) * stride + 1:stride,
                       kw:kw + (Wo - 1) * stride + 1:stride])   # (N, Cin, Ho, Wo)
    xcol = jnp.stack(taps, axis=1).reshape(N, K, S)              # (N, K, S)

    # Weight (Cout, Cin, KH, KW) -> (Cout, KH, KW, Cin) -> (Cout, K); matches
    # the (kh, kw, ci) contraction ordering of xcol.
    w2 = jnp.transpose(w_oihw, (0, 2, 3, 1)).reshape(Cout, K)
    b2 = bias.reshape(Cout, 1)

    out_flat = pl.pallas_call(
        _conv_gemm_kernel,
        grid=(N,),
        in_specs=[
            pl.BlockSpec((None, K, S), lambda n: (n, 0, 0)),   # per-batch im2col
            pl.BlockSpec((Cout, K), lambda n: (0, 0)),          # weight, resident
            pl.BlockSpec((Cout, 1), lambda n: (0, 0)),          # bias, resident
        ],
        out_specs=pl.BlockSpec((None, Cout, S), lambda n: (n, 0, 0)),
        out_shape=jax.ShapeDtypeStruct((N, Cout, S), x_nchw.dtype),
        compiler_params=pltpu.CompilerParams(
            dimension_semantics=("parallel",)),
    )(xcol, w2, b2)

    # NCHW output needs only a (free) reshape — no transpose.
    return out_flat.reshape(N, Cout, Ho, Wo)


if __name__ == "__main__":
    # Net(in_channels=4, out_channels=8, kernel_size=3, stride=1)
    N, Cin, H, W = 2, 4, 16, 16
    Cout, Ksz, stride = 8, 3, 1

    key = jax.random.PRNGKey(0)
    kx, kw, kb = jax.random.split(key, 3)
    x = jax.random.normal(kx, (N, Cin, H, W), dtype=jnp.float32)
    # Deterministic synthetic parameters with nn.Conv2d's shapes / init range.
    fan_in = Cin * Ksz * Ksz
    bound = 1.0 / (fan_in ** 0.5)
    weight = jax.random.uniform(kw, (Cout, Cin, Ksz, Ksz), jnp.float32,
                                minval=-bound, maxval=bound)
    bias = jax.random.uniform(kb, (Cout,), jnp.float32,
                              minval=-bound, maxval=bound)

    fwd = jax.jit(functools.partial(conv2d_pallas, stride=stride))
    out = jax.block_until_ready(fwd(x, weight, bias))

    # Cross-check against XLA's conv for correctness.
    ref = jax.lax.conv_general_dilated(
        x, weight, window_strides=(stride, stride), padding="VALID",
        dimension_numbers=("NCHW", "OIHW", "NCHW")) + bias.reshape(1, Cout, 1, 1)
    assert out.shape == ref.shape == (N, Cout, H - Ksz + 1, W - Ksz + 1)
    assert jnp.allclose(out, ref, atol=1e-4, rtol=1e-4)

    print("KERNEL_OK")
</pallas_src>

<mosaic_0001>
module attributes {stable_mosaic.version = 11 : i64} {
  func.func @_conv_gemm_kernel(%arg0: i32, %arg1: memref<1x36x196xf32, #tpu.memory_space<vmem>>, %arg2: memref<8x36xf32, #tpu.memory_space<vmem>>, %arg3: memref<8x1xf32, #tpu.memory_space<vmem>>, %arg4: memref<1x8x196xf32, #tpu.memory_space<vmem>>) attributes {dimension_semantics = [#tpu.dimension_semantics<parallel>], iteration_bounds = array<i64: 2>, scalar_prefetch = 0 : i64, scratch_operands = 0 : i64, tpu.core_type = #tpu.core_type<tc>, window_params = [{transform_indices = @transform_0, window_bounds = array<i64: 1, 36, 196>}, {pipeline_mode = #tpu.pipeline_mode<synchronous>, transform_indices = @transform_1, window_bounds = array<i64: 8, 36>}, {pipeline_mode = #tpu.pipeline_mode<synchronous>, transform_indices = @transform_2, window_bounds = array<i64: 8, 1>}, {transform_indices = @transform_3, window_bounds = array<i64: 1, 8, 196>}]} {
    %c0 = arith.constant 0 : index
    %c0_0 = arith.constant 0 : index
    %0 = vector.load %arg2[%c0, %c0_0] : memref<8x36xf32, #tpu.memory_space<vmem>>, vector<8x36xf32>
    %c0_1 = arith.constant 0 : index
    %c0_2 = arith.constant 0 : index
    %c0_3 = arith.constant 0 : index
    %1 = vector.load %arg1[%c0_1, %c0_2, %c0_3] : memref<1x36x196xf32, #tpu.memory_space<vmem>>, vector<1x36x196xf32>
    %2 = vector.shape_cast %1 : vector<1x36x196xf32> to vector<36x196xf32>
    %cst = arith.constant dense<0.000000e+00> : vector<8x196xf32>
    %3 = tpu.matmul %0, %2, %cst {dimension_numbers = #tpu.dot_dimension_numbers<[1], [0], [0], [1], [0, 0, 1, 1], [], []>} : vector<8x36xf32>, vector<36x196xf32>, vector<8x196xf32> -> vector<8x196xf32>
    %c0_4 = arith.constant 0 : index
    %c0_5 = arith.constant 0 : index
    %4 = vector.load %arg3[%c0_4, %c0_5] : memref<8x1xf32, #tpu.memory_space<vmem>>, vector<8x1xf32>
    %5 = vector.broadcast %4 : vector<8x1xf32> to vector<8x196xf32>
    %6 = arith.addf %3, %5 : vector<8x196xf32>
    %c0_6 = arith.constant 0 : index
    %c0_7 = arith.constant 0 : index
    %c0_8 = arith.constant 0 : index
    %7 = vector.load %arg4[%c0_6, %c0_7, %c0_8] : memref<1x8x196xf32, #tpu.memory_space<vmem>>, vector<1x8x196xf32>
    %8 = vector.shape_cast %7 : vector<1x8x196xf32> to vector<8x196xf32>
    %9 = vector.shape_cast %6 : vector<8x196xf32> to vector<1x8x196xf32>
    tpu.vector_store %arg4[%c0_6, %c0_7, %c0_8], %9 {strides = array<i32>} : memref<1x8x196xf32, #tpu.memory_space<vmem>>, vector<1x8x196xf32>,
    return
  }
  func.func @transform_0(%arg0: i32) -> (i32, i32, i32) {
    %c0_i32 = arith.constant 0 : i32
    %c0_i32_0 = arith.constant 0 : i32
    %c0_i32_1 = arith.constant 0 : i32
    return %arg0, %c0_i32, %c0_i32_0 : i32, i32, i32
  }
  func.func @transform_1(%arg0: i32) -> (i32, i32) {
    %c0_i32 = arith.constant 0 : i32
    %c0_i32_0 = arith.constant 0 : i32
    %c0_i32_1 = arith.constant 0 : i32
    return %c0_i32, %c0_i32_0 : i32, i32
  }
  func.func @transform_2(%arg0: i32) -> (i32, i32) {
    %c0_i32 = arith.constant 0 : i32
    %c0_i32_0 = arith.constant 0 : i32
    %c0_i32_1 = arith.constant 0 : i32
    return %c0_i32, %c0_i32_0 : i32, i32
  }
  func.func @transform_3(%arg0: i32) -> (i32, i32, i32) {
    %c0_i32 = arith.constant 0 : i32
    %c0_i32_0 = arith.constant 0 : i32
    %c0_i32_1 = arith.constant 0 : i32
    return %arg0, %c0_i32, %c0_i32_0 : i32, i32, i32
  }
}

</mosaic_0001>

<bundles_post_ra>
// kernel: conv2d_pallas.1
= control target key start
LH: loop header
LB: loop body
LE: loop exit
PB: predicated region body
PF: predicated region fallthrough
CT: control target
= control target key end

     0   :  { %s392_s12 = smov 0   ;;  %s419_s0 = inlined_call_operand.vmem [shape: f32[2,36,196], index: 0, kind: input, shape index: {}]   ;;  %s420_s1 = inlined_call_operand.vmem [shape: f32[8,36], index: 1, kind: input, shape index: {}]   ;;  %s421_s2 = inlined_call_operand.vmem [shape: f32[8,1], index: 2, kind: input, shape index: {}]   ;;  %s422_s3 = inlined_call_operand.vmem [shape: f32[2,8,196], index: 3, kind: output, shape index: {}]  }
   0x1 LB: > { %s328_s13 = sadd.s32 4294967295, %s368_s12   ;;  %p332_p0 = scmp.ge.s32.totalorder %s368_s12, 1  ;;  %s368_s12 = sphi %s392_s12, %s13_s12  }
   0x2   : > { %p137_p1 = scmp.lt.s32.totalorder %s368_s12, 3 }
   0x4   : > { %p138_p2 = pnand %p332_p0, %p137_p1 }
   0x5   : > { %p161_p3 = scmp.lt.s32.totalorder (!%p138_p2), %s328_s13, 1  ;;  %v370_v0 = vmov (!%p138_p2), 0.0   ;;  %v371_v1 = vmov (!%p138_p2), 0   ;;  %v182_v2 = vld [vmem:[%s421_s2] sm:$0xff] (!%p138_p2)  ;;  %vm192_vm0 = vcmask (!%p138_p2), 1043456   ;;  %vm188_vm1 = vcmask (!%p138_p2), 293888  }
   0x6   : > { %141 = sbr.rel (%p138_p2) target bundleno = 246 (0xf6), region = 32  ;;  %263 = vmatprep.mubr.f32.mxu0 (!%p138_p2), %v370_v0  ;;  %361 = vset.pattern.permute.xlu0 (!%p138_p2), %v371_v1  ;;  %v171_v17 = vld [vmem:[%s420_s1] sm:$0xff] (!%p138_p2)  ;;  %vm271_vm2 = vcmask (!%p138_p2), 556032  }
   0x7   : > { %185 = vperm.xlu0 (!%p138_p2), %361, %v182_v2  }
   0xd   : > { %s424_s13 = smov (!%p161_p3, %s328_s13), 1 }
   0xe   : > { %s350_s16 = smul.u32 80, %s424_s13  ;;  %s341_s22 = sshll.u32 %s424_s13, 4 }
   0xf   : > { %s170_s25 = scalar_lea.vmem %s422_s3, %s341_s22 }
  0x10   : > { %s165_s19 = scalar_lea.vmem %s419_s0, %s350_s16 }
  0x11   : > { %v173_v3 = vld [vmem:[%s165_s19 + $0x8] sm:$0xff]  ;;  %v175_v4 = vld [vmem:[%s165_s19 + $0x18] sm:$0xff]  ;;  %v172_v5 = vld [vmem:[%s165_s19] sm:$0xff] }
  0x12   : > { %v342_v6 = vpack.c.bf16 %v175_v4, %v173_v3  ;;  %v174_v7 = vld [vmem:[%s165_s19 + $0x10] sm:$0xff]  ;;  %v177_v8 = vld [vmem:[%s165_s19 + $0x28] sm:$0xff]  ;;  %v179_v9 = vld [vmem:[%s165_s19 + $0x38] sm:$0xff] }
  0x13   : > { %v344_v10 = vpack.c.bf16 %v174_v7, %v172_v5  ;;  %v346_v11 = vpack.c.bf16 %v179_v9, %v177_v8  ;;  %v176_v12 = vld [vmem:[%s165_s19 + $0x20] sm:$0xff]  ;;  %v178_v13 = vld [vmem:[%s165_s19 + $0x30] sm:$0xff]  ;;  %v181_v15 = vld [vmem:[%s165_s19 + $0x48] sm:$0xf] }
  0x14   : > { %343 = vmatprep.subr.bf16.mxu0 %v342_v6  ;;  %v348_v14 = vpack.c.bf16 %v178_v13, %v176_v12  ;;  %v180_v16 = vld [vmem:[%s165_s19 + $0x40] sm:$0xf] }
  0x15   : > { %345 = vmatpush1.bf16.msra.mxu0 %v344_v10 }
  0x16   : > { %347 = vmatprep.subr.bf16.mxu0 %v346_v11 }
  0x19   : > { %349 = vmatpush1.bf16.msra.mxu0 %v348_v14 }
  0x1a   : > { %336 = vmatprep.subr.msk.mxu0 %vm192_vm0, %v181_v15 }
  0x1d   : > { %337 = vmatpush1.msk.msra.mxu0 %vm192_vm0, %v180_v16 }
  0x1e   : > { %338 = vmatmul.mubr.msk.f32.vlgmr.msra.gmra.mrb[0].mxu0 %vm188_vm1, %v171_v17 }
  0x86   : > { %v186_v18 = vpop.permute.xlu0 %185 }
  0xf1   : > { %v265_v19 = vpop.f32.mrb[0].mxu0 }
  0xf2   : > { %v266_v20 = vadd.f32 %v265_v19, %v186_v18  ;;  %v267_v21 = vpop.f32.mrb[1].mxu0 }
  0xf3   : > { %v268_v22 = vadd.f32 %v267_v21, %v186_v18 }
  0xf4   : > { %270 = vst [vmem:[%s170_s25] sm:$0xff] %v266_v20 }
  0xf5   : > { %272 = vst.msk [vmem:[%s170_s25 + $0x8] sm:$0xff] %vm271_vm2, %v268_v22 }
  0xf6 PF: > { %s13_s12 = sadd.s32 1, %s368_s12  }
  0xf7   : > { %p10_p4 = scmp.ge.s32.totalorder %s13_s12, 4  }
  0xf9   :  { %12 = sbr.rel (!%p10_p4) target bundleno = 1 (0x1), region = 62 }

</bundles_post_ra>
